<compile_context>
chip_gen: v6e
topology: v6e:2x2x1
jax: 0.10.0
libtpu: 0.0.40
codegen_flags: <defaults>
</compile_context>

<pallas_src>
import functools

import jax
import jax.numpy as jnp
from jax import lax
from jax.experimental import pallas as pl
from jax.experimental.pallas import tpu as pltpu


def _lstm_kernel(x_ref, wih_ref, whh_ref, b_ref, wlin_ref, blin_ref, out_ref,
                 *, seq_len, batch):
    T, B = seq_len, batch
    I = x_ref.shape[-1]
    H = whh_ref.shape[0]

    # ---- Hoisted input projection (off the serial dependence chain) -------
    x_flat = x_ref[...]                                   # (T*B, I)
    if I == 1:
        # Pure VPU broadcast-multiply: (T*B, 1) * (1, 4H) -> (T*B, 4H).
        xg = x_flat * wih_ref[...] + b_ref[...]
    else:
        xg = (jnp.dot(x_flat, wih_ref[...],
                      preferred_element_type=jnp.float32)
              + b_ref[...])                               # (T*B, 4H)

    whh = whh_ref[...]                                    # (H, 4H), in vregs

    # ---- Recurrence: h/c carried in vregs, fully unrolled (T is static) ----
    h = jnp.zeros((B, H), jnp.float32)
    c = jnp.zeros((B, H), jnp.float32)
    for t in range(T):
        gates = xg[t * B:(t + 1) * B, :] + jnp.dot(
            h, whh, preferred_element_type=jnp.float32)   # (B, 4H)
        # One sigmoid over the full (B, 4H) gate block serves i/f/o; the extra
        # work on the g lanes is free (EUP operates on whole vregs). One tanh
        # for the candidate gate. 2 EUP pushes/step on the serial chain.
        sig = jax.nn.sigmoid(gates)
        i_g = sig[:, 0 * H:1 * H]
        f_g = sig[:, 1 * H:2 * H]
        o_g = sig[:, 3 * H:4 * H]
        g_g = jnp.tanh(gates[:, 2 * H:3 * H])
        c = f_g * c + i_g * g_g
        h = o_g * jnp.tanh(c)

    # predictions.view(-1, I)[-1]: Linear applied to the final hidden state,
    # last batch row only -> emit (1, I) directly.
    out_ref[...] = (
        jnp.dot(h[B - 1:B, :], wlin_ref[...],
                preferred_element_type=jnp.float32)
        + blin_ref[...]
    )


def key_mouse_lstm_forward(input_seq, params, *, batch_size, input_size,
                           hidden_size):
    """Equivalent of KeyMouseLSTM.forward(input_seq) with zero initial state."""
    # TODO(synk): cross-call persistence of self.hidden_cell is not modeled;
    # the kernel assumes the zero state set by init_hidden().
    w_ih_t, w_hh_t, b_gates, w_lin_t, b_lin = params
    x = input_seq.reshape(-1, batch_size, input_size).astype(jnp.float32)
    T, B, I = x.shape
    del hidden_size  # derived inside the kernel from W_hh
    x2d = x.reshape(T * B, I)  # reshape in the wrapper (layout plumbing)

    vmem = pl.BlockSpec(memory_space=pltpu.MemorySpace.VMEM)
    kernel = functools.partial(_lstm_kernel, seq_len=T, batch=B)
    out = pl.pallas_call(
        kernel,
        out_shape=jax.ShapeDtypeStruct((1, I), jnp.float32),
        in_specs=[vmem] * 6,
        out_specs=vmem,
    )(x2d, w_ih_t, w_hh_t, b_gates, w_lin_t, b_lin)

    # (1, I) -> (I,); matches predictions.view(-1, I)[-1].
    return out[0]


def init_params(key, input_size, hidden_size):
    """Deterministic param init matching PyTorch nn.LSTM/nn.Linear shapes."""
    I, H = input_size, hidden_size
    k = 1.0 / jnp.sqrt(jnp.float32(H))
    ks = jax.random.split(key, 6)
    u = lambda kk, shape: jax.random.uniform(kk, shape, jnp.float32, -k, k)
    w_ih = u(ks[0], (4 * H, I))     # torch weight_ih_l0
    w_hh = u(ks[1], (4 * H, H))     # torch weight_hh_l0
    b_ih = u(ks[2], (4 * H,))
    b_hh = u(ks[3], (4 * H,))
    w_lin = u(ks[4], (I, H))        # torch linear.weight
    b_lin = u(ks[5], (I,))
    params = (
        jnp.transpose(w_ih),                       # (I, 4H)
        jnp.transpose(w_hh),                       # (H, 4H)
        (b_ih + b_hh).reshape(1, 4 * H),           # (1, 4H)
        jnp.transpose(w_lin),                      # (H, I)
        b_lin.reshape(1, I),                       # (1, I)
    )
    return params


def _reference_forward(input_seq, params, *, batch_size, input_size,
                       hidden_size):
    """Pure-JAX reference of the same forward pass (for a correctness check)."""
    w_ih_t, w_hh_t, b_gates, w_lin_t, b_lin = params
    x = input_seq.reshape(-1, batch_size, input_size).astype(jnp.float32)
    H = hidden_size
    h = jnp.zeros((batch_size, H), jnp.float32)
    c = jnp.zeros((batch_size, H), jnp.float32)

    def step(carry, x_t):
        h, c = carry
        g = x_t @ w_ih_t + h @ w_hh_t + b_gates
        i_g = jax.nn.sigmoid(g[:, 0 * H:1 * H])
        f_g = jax.nn.sigmoid(g[:, 1 * H:2 * H])
        g_g = jnp.tanh(g[:, 2 * H:3 * H])
        o_g = jax.nn.sigmoid(g[:, 3 * H:4 * H])
        c = f_g * c + i_g * g_g
        h = o_g * jnp.tanh(c)
        return (h, c), h

    (h, c), _ = lax.scan(step, (h, c), x)
    pred = h @ w_lin_t + b_lin
    return pred[-1]


if __name__ == "__main__":
    # Small shapes consistent with the module: seq=8, batch=1, input_size=1,
    # hidden_layer_size=32.
    SEQ, BATCH, INPUT, HIDDEN = 8, 1, 1, 32

    key = jax.random.PRNGKey(0)
    k_x, k_p = jax.random.split(key)
    input_seq = jax.random.normal(k_x, (SEQ,), jnp.float32)
    params = init_params(k_p, INPUT, HIDDEN)

    out = key_mouse_lstm_forward(
        input_seq, params,
        batch_size=BATCH, input_size=INPUT, hidden_size=HIDDEN)
    out = jax.block_until_ready(out)

    ref = _reference_forward(
        input_seq, params,
        batch_size=BATCH, input_size=INPUT, hidden_size=HIDDEN)
    assert out.shape == (INPUT,)
    assert jnp.allclose(out, ref, atol=1e-5, rtol=1e-5), (out, ref)

    print("KERNEL_OK")
</pallas_src>

<mosaic_0001>
module attributes {stable_mosaic.version = 11 : i64} {
  func.func @_lstm_kernel(%arg0: memref<8x1xf32, #tpu.memory_space<vmem>>, %arg1: memref<1x128xf32, #tpu.memory_space<vmem>>, %arg2: memref<32x128xf32, #tpu.memory_space<vmem>>, %arg3: memref<1x128xf32, #tpu.memory_space<vmem>>, %arg4: memref<32x1xf32, #tpu.memory_space<vmem>>, %arg5: memref<1x1xf32, #tpu.memory_space<vmem>>, %arg6: memref<1x1xf32, #tpu.memory_space<vmem>>) attributes {dimension_semantics = [], scalar_prefetch = 0 : i64, scratch_operands = 0 : i64, tpu.core_type = #tpu.core_type<tc>} {
    %c0 = arith.constant 0 : index
    %c0_0 = arith.constant 0 : index
    %0 = vector.load %arg0[%c0, %c0_0] : memref<8x1xf32, #tpu.memory_space<vmem>>, vector<8x1xf32>
    %c0_1 = arith.constant 0 : index
    %c0_2 = arith.constant 0 : index
    %1 = vector.load %arg1[%c0_1, %c0_2] : memref<1x128xf32, #tpu.memory_space<vmem>>, vector<1x128xf32>
    %2 = vector.broadcast %0 : vector<8x1xf32> to vector<8x128xf32>
    %3 = vector.broadcast %1 : vector<1x128xf32> to vector<8x128xf32>
    %4 = arith.mulf %2, %3 : vector<8x128xf32>
    %c0_3 = arith.constant 0 : index
    %c0_4 = arith.constant 0 : index
    %5 = vector.load %arg3[%c0_3, %c0_4] : memref<1x128xf32, #tpu.memory_space<vmem>>, vector<1x128xf32>
    %6 = vector.broadcast %5 : vector<1x128xf32> to vector<8x128xf32>
    %7 = arith.addf %4, %6 : vector<8x128xf32>
    %c0_5 = arith.constant 0 : index
    %c0_6 = arith.constant 0 : index
    %8 = vector.load %arg2[%c0_5, %c0_6] : memref<32x128xf32, #tpu.memory_space<vmem>>, vector<32x128xf32>
    %cst = arith.constant 0.000000e+00 : f32
    %9 = vector.broadcast %cst : f32 to vector<1x32xf32>
    %cst_7 = arith.constant 0.000000e+00 : f32
    %10 = vector.broadcast %cst_7 : f32 to vector<1x32xf32>
    %11 = vector.extract_strided_slice %7 {offsets = [0, 0], sizes = [1, 128], strides = [1, 1]} : vector<8x128xf32> to vector<1x128xf32>
    %cst_8 = arith.constant dense<0.000000e+00> : vector<1x128xf32>
    %12 = tpu.matmul %9, %8, %cst_8 {dimension_numbers = #tpu.dot_dimension_numbers<[1], [0], [0], [1], [0, 0, 1, 1], [], []>} : vector<1x32xf32>, vector<32x128xf32>, vector<1x128xf32> -> vector<1x128xf32>
    %13 = arith.addf %11, %12 : vector<1x128xf32>
    %14 = arith.negf %13 : vector<1x128xf32>
    %15 = math.exp %14 : vector<1x128xf32>
    %cst_9 = arith.constant 1.000000e+00 : f32
    %16 = vector.broadcast %cst_9 : f32 to vector<1x128xf32>
    %17 = arith.addf %16, %15 : vector<1x128xf32>
    %18 = arith.divf %16, %17 : vector<1x128xf32>
    %19 = vector.extract_strided_slice %18 {offsets = [0, 0], sizes = [1, 32], strides = [1, 1]} : vector<1x128xf32> to vector<1x32xf32>
    %20 = vector.extract_strided_slice %18 {offsets = [0, 32], sizes = [1, 32], strides = [1, 1]} : vector<1x128xf32> to vector<1x32xf32>
    %21 = vector.extract_strided_slice %18 {offsets = [0, 96], sizes = [1, 32], strides = [1, 1]} : vector<1x128xf32> to vector<1x32xf32>
    %22 = vector.extract_strided_slice %13 {offsets = [0, 64], sizes = [1, 32], strides = [1, 1]} : vector<1x128xf32> to vector<1x32xf32>
    %23 = math.tanh %22 : vector<1x32xf32>
    %24 = arith.mulf %20, %10 : vector<1x32xf32>
    %25 = arith.mulf %19, %23 : vector<1x32xf32>
    %26 = arith.addf %24, %25 : vector<1x32xf32>
    %27 = math.tanh %26 : vector<1x32xf32>
    %28 = arith.mulf %21, %27 : vector<1x32xf32>
    %29 = vector.extract_strided_slice %7 {offsets = [1, 0], sizes = [1, 128], strides = [1, 1]} : vector<8x128xf32> to vector<1x128xf32>
    %cst_10 = arith.constant dense<0.000000e+00> : vector<1x128xf32>
    %30 = tpu.matmul %28, %8, %cst_10 {dimension_numbers = #tpu.dot_dimension_numbers<[1], [0], [0], [1], [0, 0, 1, 1], [], []>} : vector<1x32xf32>, vector<32x128xf32>, vector<1x128xf32> -> vector<1x128xf32>
    %31 = arith.addf %29, %30 : vector<1x128xf32>
    %32 = arith.negf %31 : vector<1x128xf32>
    %33 = math.exp %32 : vector<1x128xf32>
    %cst_11 = arith.constant 1.000000e+00 : f32
    %34 = vector.broadcast %cst_11 : f32 to vector<1x128xf32>
    %35 = arith.addf %34, %33 : vector<1x128xf32>
    %36 = arith.divf %34, %35 : vector<1x128xf32>
    %37 = vector.extract_strided_slice %36 {offsets = [0, 0], sizes = [1, 32], strides = [1, 1]} : vector<1x128xf32> to vector<1x32xf32>
    %38 = vector.extract_strided_slice %36 {offsets = [0, 32], sizes = [1, 32], strides = [1, 1]} : vector<1x128xf32> to vector<1x32xf32>
    %39 = vector.extract_strided_slice %36 {offsets = [0, 96], sizes = [1, 32], strides = [1, 1]} : vector<1x128xf32> to vector<1x32xf32>
    %40 = vector.extract_strided_slice %31 {offsets = [0, 64], sizes = [1, 32], strides = [1, 1]} : vector<1x128xf32> to vector<1x32xf32>
    %41 = math.tanh %40 : vector<1x32xf32>
    %42 = arith.mulf %38, %26 : vector<1x32xf32>
    %43 = arith.mulf %37, %41 : vector<1x32xf32>
    %44 = arith.addf %42, %43 : vector<1x32xf32>
    %45 = math.tanh %44 : vector<1x32xf32>
    %46 = arith.mulf %39, %45 : vector<1x32xf32>
    %47 = vector.extract_strided_slice %7 {offsets = [2, 0], sizes = [1, 128], strides = [1, 1]} : vector<8x128xf32> to vector<1x128xf32>
    %cst_12 = arith.constant dense<0.000000e+00> : vector<1x128xf32>
    %48 = tpu.matmul %46, %8, %cst_12 {dimension_numbers = #tpu.dot_dimension_numbers<[1], [0], [0], [1], [0, 0, 1, 1], [], []>} : vector<1x32xf32>, vector<32x128xf32>, vector<1x128xf32> -> vector<1x128xf32>
    %49 = arith.addf %47, %48 : vector<1x128xf32>
    %50 = arith.negf %49 : vector<1x128xf32>
    %51 = math.exp %50 : vector<1x128xf32>
    %cst_13 = arith.constant 1.000000e+00 : f32
    %52 = vector.broadcast %cst_13 : f32 to vector<1x128xf32>
    %53 = arith.addf %52, %51 : vector<1x128xf32>
    %54 = arith.divf %52, %53 : vector<1x128xf32>
    %55 = vector.extract_strided_slice %54 {offsets = [0, 0], sizes = [1, 32], strides = [1, 1]} : vector<1x128xf32> to vector<1x32xf32>
    %56 = vector.extract_strided_slice %54 {offsets = [0, 32], sizes = [1, 32], strides = [1, 1]} : vector<1x128xf32> to vector<1x32xf32>
    %57 = vector.extract_strided_slice %54 {offsets = [0, 96], sizes = [1, 32], strides = [1, 1]} : vector<1x128xf32> to vector<1x32xf32>
    %58 = vector.extract_strided_slice %49 {offsets = [0, 64], sizes = [1, 32], strides = [1, 1]} : vector<1x128xf32> to vector<1x32xf32>
    %59 = math.tanh %58 : vector<1x32xf32>
    %60 = arith.mulf %56, %44 : vector<1x32xf32>
    %61 = arith.mulf %55, %59 : vector<1x32xf32>
    %62 = arith.addf %60, %61 : vector<1x32xf32>
    %63 = math.tanh %62 : vector<1x32xf32>
    %64 = arith.mulf %57, %63 : vector<1x32xf32>
    %65 = vector.extract_strided_slice %7 {offsets = [3, 0], sizes = [1, 128], strides = [1, 1]} : vector<8x128xf32> to vector<1x128xf32>
    %cst_14 = arith.constant dense<0.000000e+00> : vector<1x128xf32>
    %66 = tpu.matmul %64, %8, %cst_14 {dimension_numbers = #tpu.dot_dimension_numbers<[1], [0], [0], [1], [0, 0, 1, 1], [], []>} : vector<1x32xf32>, vector<32x128xf32>, vector<1x128xf32> -> vector<1x128xf32>
    %67 = arith.addf %65, %66 : vector<1x128xf32>
    %68 = arith.negf %67 : vector<1x128xf32>
    %69 = math.exp %68 : vector<1x128xf32>
    %cst_15 = arith.constant 1.000000e+00 : f32
    %70 = vector.broadcast %cst_15 : f32 to vector<1x128xf32>
    %71 = arith.addf %70, %69 : vector<1x128xf32>
    %72 = arith.divf %70, %71 : vector<1x128xf32>
    %73 = vector.extract_strided_slice %72 {offsets = [0, 0], sizes = [1, 32], strides = [1, 1]} : vector<1x128xf32> to vector<1x32xf32>
    %74 = vector.extract_strided_slice %72 {offsets = [0, 32], sizes = [1, 32], strides = [1, 1]} : vector<1x128xf32> to vector<1x32xf32>
    %75 = vector.extract_strided_slice %72 {offsets = [0, 96], sizes = [1, 32], strides = [1, 1]} : vector<1x128xf32> to vector<1x32xf32>
    %76 = vector.extract_strided_slice %67 {offsets = [0, 64], sizes = [1, 32], strides = [1, 1]} : vector<1x128xf32> to vector<1x32xf32>
    %77 = math.tanh %76 : vector<1x32xf32>
    %78 = arith.mulf %74, %62 : vector<1x32xf32>
    %79 = arith.mulf %73, %77 : vector<1x32xf32>
    %80 = arith.addf %78, %79 : vector<1x32xf32>
    %81 = math.tanh %80 : vector<1x32xf32>
    %82 = arith.mulf %75, %81 : vector<1x32xf32>
    %83 = vector.extract_strided_slice %7 {offsets = [4, 0], sizes = [1, 128], strides = [1, 1]} : vector<8x128xf32> to vector<1x128xf32>
    %cst_16 = arith.constant dense<0.000000e+00> : vector<1x128xf32>
    %84 = tpu.matmul %82, %8, %cst_16 {dimension_numbers = #tpu.dot_dimension_numbers<[1], [0], [0], [1], [0, 0, 1, 1], [], []>} : vector<1x32xf32>, vector<32x128xf32>, vector<1x128xf32> -> vector<1x128xf32>
    %85 = arith.addf %83, %84 : vector<1x128xf32>
    %86 = arith.negf %85 : vector<1x128xf32>
    %87 = math.exp %86 : vector<1x128xf32>
    %cst_17 = arith.constant 1.000000e+00 : f32
    %88 = vector.broadcast %cst_17 : f32 to vector<1x128xf32>
    %89 = arith.addf %88, %87 : vector<1x128xf32>
    %90 = arith.divf %88, %89 : vector<1x128xf32>
    %91 = vector.extract_strided_slice %90 {offsets = [0, 0], sizes = [1, 32], strides = [1, 1]} : vector<1x128xf32> to vector<1x32xf32>
    %92 = vector.extract_strided_slice %90 {offsets = [0, 32], sizes = [1, 32], strides = [1, 1]} : vector<1x128xf32> to vector<1x32xf32>
    %93 = vector.extract_strided_slice %90 {offsets = [0, 96], sizes = [1, 32], strides = [1, 1]} : vector<1x128xf32> to vector<1x32xf32>
    %94 = vector.extract_strided_slice %85 {offsets = [0, 64], sizes = [1, 32], strides = [1, 1]} : vector<1x128xf32> to vector<1x32xf32>
    %95 = math.tanh %94 : vector<1x32xf32>
    %96 = arith.mulf %92, %80 : vector<1x32xf32>
    %97 = arith.mulf %91, %95 : vector<1x32xf32>
    %98 = arith.addf %96, %97 : vector<1x32xf32>
    %99 = math.tanh %98 : vector<1x32xf32>
    %100 = arith.mulf %93, %99 : vector<1x32xf32>
    %101 = vector.extract_strided_slice %7 {offsets = [5, 0], sizes = [1, 128], strides = [1, 1]} : vector<8x128xf32> to vector<1x128xf32>
    %cst_18 = arith.constant dense<0.000000e+00> : vector<1x128xf32>
    %102 = tpu.matmul %100, %8, %cst_18 {dimension_numbers = #tpu.dot_dimension_numbers<[1], [0], [0], [1], [0, 0, 1, 1], [], []>} : vector<1x32xf32>, vector<32x128xf32>, vector<1x128xf32> -> vector<1x128xf32>
    %103 = arith.addf %101, %102 : vector<1x128xf32>
    %104 = arith.negf %103 : vector<1x128xf32>
    %105 = math.exp %104 : vector<1x128xf32>
    %cst_19 = arith.constant 1.000000e+00 : f32
    %106 = vector.broadcast %cst_19 : f32 to vector<1x128xf32>
    %107 = arith.addf %106, %105 : vector<1x128xf32>
    %108 = arith.divf %106, %107 : vector<1x128xf32>
    %109 = vector.extract_strided_slice %108 {offsets = [0, 0], sizes = [1, 32], strides = [1, 1]} : vector<1x128xf32> to vector<1x32xf32>
    %110 = vector.extract_strided_slice %108 {offsets = [0, 32], sizes = [1, 32], strides = [1, 1]} : vector<1x128xf32> to vector<1x32xf32>
    %111 = vector.extract_strided_slice %108 {offsets = [0, 96], sizes = [1, 32], strides = [1, 1]} : vector<1x128xf32> to vector<1x32xf32>
    %112 = vector.extract_strided_slice %103 {offsets = [0, 64], sizes = [1, 32], strides = [1, 1]} : vector<1x128xf32> to vector<1x32xf32>
    %113 = math.tanh %112 : vector<1x32xf32>
    %114 = arith.mulf %110, %98 : vector<1x32xf32>
    %115 = arith.mulf %109, %113 : vector<1x32xf32>
    %116 = arith.addf %114, %115 : vector<1x32xf32>
    %117 = math.tanh %116 : vector<1x32xf32>
    %118 = arith.mulf %111, %117 : vector<1x32xf32>
    %119 = vector.extract_strided_slice %7 {offsets = [6, 0], sizes = [1, 128], strides = [1, 1]} : vector<8x128xf32> to vector<1x128xf32>
    %cst_20 = arith.constant dense<0.000000e+00> : vector<1x128xf32>
    %120 = tpu.matmul %118, %8, %cst_20 {dimension_numbers = #tpu.dot_dimension_numbers<[1], [0], [0], [1], [0, 0, 1, 1], [], []>} : vector<1x32xf32>, vector<32x128xf32>, vector<1x128xf32> -> vector<1x128xf32>
    %121 = arith.addf %119, %120 : vector<1x128xf32>
    %122 = arith.negf %121 : vector<1x128xf32>
    %123 = math.exp %122 : vector<1x128xf32>
    %cst_21 = arith.constant 1.000000e+00 : f32
    %124 = vector.broadcast %cst_21 : f32 to vector<1x128xf32>
    %125 = arith.addf %124, %123 : vector<1x128xf32>
    %126 = arith.divf %124, %125 : vector<1x128xf32>
    %127 = vector.extract_strided_slice %126 {offsets = [0, 0], sizes = [1, 32], strides = [1, 1]} : vector<1x128xf32> to vector<1x32xf32>
    %128 = vector.extract_strided_slice %126 {offsets = [0, 32], sizes = [1, 32], strides = [1, 1]} : vector<1x128xf32> to vector<1x32xf32>
    %129 = vector.extract_strided_slice %126 {offsets = [0, 96], sizes = [1, 32], strides = [1, 1]} : vector<1x128xf32> to vector<1x32xf32>
    %130 = vector.extract_strided_slice %121 {offsets = [0, 64], sizes = [1, 32], strides = [1, 1]} : vector<1x128xf32> to vector<1x32xf32>
    %131 = math.tanh %130 : vector<1x32xf32>
    %132 = arith.mulf %128, %116 : vector<1x32xf32>
    %133 = arith.mulf %127, %131 : vector<1x32xf32>
    %134 = arith.addf %132, %133 : vector<1x32xf32>
    %135 = math.tanh %134 : vector<1x32xf32>
    %136 = arith.mulf %129, %135 : vector<1x32xf32>
    %137 = vector.extract_strided_slice %7 {offsets = [7, 0], sizes = [1, 128], strides = [1, 1]} : vector<8x128xf32> to vector<1x128xf32>
    %cst_22 = arith.constant dense<0.000000e+00> : vector<1x128xf32>
    %138 = tpu.matmul %136, %8, %cst_22 {dimension_numbers = #tpu.dot_dimension_numbers<[1], [0], [0], [1], [0, 0, 1, 1], [], []>} : vector<1x32xf32>, vector<32x128xf32>, vector<1x128xf32> -> vector<1x128xf32>
    %139 = arith.addf %137, %138 : vector<1x128xf32>
    %140 = arith.negf %139 : vector<1x128xf32>
    %141 = math.exp %140 : vector<1x128xf32>
    %cst_23 = arith.constant 1.000000e+00 : f32
    %142 = vector.broadcast %cst_23 : f32 to vector<1x128xf32>
    %143 = arith.addf %142, %141 : vector<1x128xf32>
    %144 = arith.divf %142, %143 : vector<1x128xf32>
    %145 = vector.extract_strided_slice %144 {offsets = [0, 0], sizes = [1, 32], strides = [1, 1]} : vector<1x128xf32> to vector<1x32xf32>
    %146 = vector.extract_strided_slice %144 {offsets = [0, 32], sizes = [1, 32], strides = [1, 1]} : vector<1x128xf32> to vector<1x32xf32>
    %147 = vector.extract_strided_slice %144 {offsets = [0, 96], sizes = [1, 32], strides = [1, 1]} : vector<1x128xf32> to vector<1x32xf32>
    %148 = vector.extract_strided_slice %139 {offsets = [0, 64], sizes = [1, 32], strides = [1, 1]} : vector<1x128xf32> to vector<1x32xf32>
    %149 = math.tanh %148 : vector<1x32xf32>
    %150 = arith.mulf %146, %134 : vector<1x32xf32>
    %151 = arith.mulf %145, %149 : vector<1x32xf32>
    %152 = arith.addf %150, %151 : vector<1x32xf32>
    %153 = math.tanh %152 : vector<1x32xf32>
    %154 = arith.mulf %147, %153 : vector<1x32xf32>
    %c0_24 = arith.constant 0 : index
    %c0_25 = arith.constant 0 : index
    %155 = vector.load %arg4[%c0_24, %c0_25] : memref<32x1xf32, #tpu.memory_space<vmem>>, vector<32x1xf32>
    %cst_26 = arith.constant dense<0.000000e+00> : vector<1x1xf32>
    %156 = tpu.matmul %154, %155, %cst_26 {dimension_numbers = #tpu.dot_dimension_numbers<[1], [0], [0], [1], [0, 0, 1, 1], [], []>} : vector<1x32xf32>, vector<32x1xf32>, vector<1x1xf32> -> vector<1x1xf32>
    %c0_27 = arith.constant 0 : index
    %c0_28 = arith.constant 0 : index
    %157 = vector.load %arg5[%c0_27, %c0_28] : memref<1x1xf32, #tpu.memory_space<vmem>>, vector<1x1xf32>
    %158 = arith.addf %156, %157 : vector<1x1xf32>
    %c0_29 = arith.constant 0 : index
    %c0_30 = arith.constant 0 : index
    %159 = vector.load %arg6[%c0_29, %c0_30] : memref<1x1xf32, #tpu.memory_space<vmem>>, vector<1x1xf32>
    tpu.vector_store %arg6[%c0_29, %c0_30], %158 {strides = array<i32>} : memref<1x1xf32, #tpu.memory_space<vmem>>, vector<1x1xf32>,
    return
  }
}

</mosaic_0001>

<bundles_post_ra>
// kernel: tpu_custom_call.1
= control target key start
LH: loop header
LB: loop body
LE: loop exit
PB: predicated region body
PF: predicated region fallthrough
CT: control target
= control target key end

     0   :  { %s1476_s0 = inlined_call_operand.vmem [shape: f32[8,1], index: 0, kind: input, shape index: {}]   ;;  %s1477_s1 = inlined_call_operand.vmem [shape: f32[1,128], index: 1, kind: input, shape index: {}]   ;;  %s1478_s2 = inlined_call_operand.vmem [shape: f32[32,128], index: 2, kind: input, shape index: {}]   ;;  %s1479_s3 = inlined_call_operand.vmem [shape: f32[1,128], index: 3, kind: input, shape index: {}]   ;;  %s1480_s4 = inlined_call_operand.vmem [shape: f32[32,1], index: 4, kind: input, shape index: {}]   ;;  %s1481_s5 = inlined_call_operand.<no memory space> [shape: f32[1,1], index: 5, kind: input, shape index: {}]   ;;  %s1482_s6 = inlined_call_operand.hbm [shape: f32[1,1], index: 6, kind: output, shape index: {}]  }
   0x1   :  { %v11_v0 = vstv %s1481_s5 }
   0x2   :  { %12 = vst [vmem:[#allocation2] sm:$0x1] %v11_v0 }
   0x3   :  { %v1298_v1 = vld [vmem:[%s1478_s2 + $0x18] sm:$0xff]  ;;  %v1251_v2 = vmov 0.0   ;;  %v1304_v3 = vld [vmem:[%s1478_s2 + $0x10] sm:$0xff]  ;;  %vm1252_vm0 = vmmov 0   ;;  %v26_v4 = vld [vmem:[%s1476_s0] sm:$0xff]  ;;  %v1253_v5 = vmov 0  }
   0x4   :  { %1059 = vmatprep.subr.mxu0 %v1251_v2  ;;  %1067 = vmatprep.mubr.msk.f32.mxu0 %vm1252_vm0, %v1251_v2 }
   0x5   :  { %1060 = vmatpush3.msra.mxu0 %v1298_v1  ;;  %1164 = vset.pattern.permute.xlu0 %v1253_v5 }
   0x6   :  { %13 = vsyncpa [#allocation4], 0  ;;  %1061 = vmatprep.subr.mxu0 %v1251_v2  ;;  %v1316_v6 = vld [vmem:[%s1478_s2 + $0x8] sm:$0xff]  ;;  %30 = vperm.xlu0 %1164, %v26_v4   ;;  %v1324_v7 = vld [vmem:[%s1478_s2] sm:$0xff]  ;;  %s1254_s10 = smov 64   ;;  %vm52_vm1 = vcmask 261120  }
   0x7   :  { %1062 = vmatpush3.msra.mxu0 %v1304_v3  ;;  %1070 = vmatprep.subr.mxu1 %v1251_v2  ;;  %v996_v8 = vld [vmem:[%s1477_s1] ss:$0 sm:$0xff]  ;;  %s1255_s1 = smov 32   ;;  %s1256_s18 = smov [#allocation3]   ;;  %vm980_vm2 = vcmask 0  }
   0x8   :  { %1063 = vmatprep.subr.mxu0 %v1251_v2  ;;  %1071 = vmatpush3.msra.mxu1 %v1298_v1  ;;  %v997_v11 = vld [vmem:[%s1479_s3] ss:$0 sm:$0xff]  ;;  %s988_s19 = sshll.u32 %s1256_s18, 4  ;;  %s989_s19 = int_to_ptr.vmem [resolvable:$true] %s988_s19 }
   0x9   :  { %1064 = vmatpush3.msra.mxu0 %v1316_v6  ;;  %1072 = vmatprep.subr.mxu1 %v1251_v2  ;;  %s1233_s20 = scalar_lea.vmem %s989_s19, 32  ;;  %p1234_p1 = scmp.lt.s32.totalorder %s989_s19, %s989_s19 }
   0xa   :  { %1065 = vmatprep.subr.mxu0 %v1251_v2  ;;  %1073 = vmatpush3.msra.mxu1 %v1304_v3 }
   0xb   :  { %1066 = vmatpush3.msra.mxu0 %v1324_v7  ;;  %1074 = vmatprep.subr.mxu1 %v1251_v2 }
   0xc   :  { %1068 = vmatmul.mubr.f32.vlgmr.msra.gmra.mxu0 %v1251_v2  ;;  %1075 = vmatpush3.msra.mxu1 %v1316_v6 }
   0xd   :  { %1076 = vmatprep.subr.mxu1 %v1251_v2  ;;  %1078 = vmatprep.mubr.msk.f32.mxu1 %vm1252_vm0, %v1251_v2 }
   0xe   :  { %1077 = vmatpush3.msra.mxu1 %v1324_v7  ;;  %1081 = vmatprep.subr.mxu0 %v1251_v2 }
   0xf   :  { %1082 = vmatpush3.msra.mxu0 %v1298_v1  ;;  %1089 = vmatprep.mubr.msk.f32.mxu0 %vm1252_vm0, %v1251_v2 }
  0x10   :  { %1083 = vmatprep.subr.mxu0 %v1251_v2  ;;  %1092 = vmatprep.subr.mxu1 %v1251_v2 }
  0x11   :  { %1084 = vmatpush3.msra.mxu0 %v1304_v3 }
  0x12   :  { %1085 = vmatprep.subr.mxu0 %v1251_v2 }
  0x13   :  { %1086 = vmatpush3.msra.mxu0 %v1316_v6 }
  0x14   :  { %1087 = vmatprep.subr.mxu0 %v1251_v2 }
  0x15   :  { %1088 = vmatpush3.msra.mxu0 %v1324_v7 }
  0x16   :  { %1103 = vmatprep.subr.mxu0 %v1251_v2 }
  0x81   :  { %v31_v9 = vpop.permute.xlu0 %30 }
  0x82   :  { %v39_v10 = vmul.f32 %v996_v8, %v31_v9 }
  0x84   :  { %v1357_v12 = vadd.f32 %v997_v11, %v39_v10 }
  0xcc   :  { %v122_v13 = vpop.f32.mrf.mxu0 }
  0xcd   :  { %v126_v14 = vadd.f32 %v122_v13, %v1357_v12 }
  0xce   :  { %v1069_v15 = vpop.f32.mrf.mxu0 }
  0xcf   :  { %1165 = vtanh.f32 %v126_v14  ;;  %v998_v17 = vmul.f32 -1.442695, %v126_v14 }
  0xd1   :  { %1167 = vpow2.f32 %v998_v17 }
  0xdc   :  { %v1166_v16 = vpop.eup %1165 }
  0xdd   :  { %136 = vrot.lane.b32.xlu0 %v1166_v16, %s1254_s10 }
  0xde   :  { %v1168_v18 = vpop.eup %1167 }
  0xdf   :  { %v130_v19 = vadd.f32 1.0, %v1168_v18 }
  0xe1   :  { %1169 = vrcp.f32 %v130_v19 }
  0xee   :  { %v1170_v20 = vpop.eup %1169 }
  0xef   :  { %v134_v23 = vmul.f32 0.0, %v1170_v20 }
 0x14f   :  { %v137_v21 = vpop.permute.xlu0 %136 }
 0x150   :  { %v139_v22 = vmul.f32 %v1170_v20, %v137_v21 }
 0x152   :  { %141 = vrot.lane.b32.xlu1 %v139_v22, %s1255_s1 }
 0x1c4   :  { %v142_v24 = vpop.permute.xlu1 %141 }
 0x1c5   :  { %v144_v25 = vadd.f32 %v142_v24, %v134_v23 }
 0x1c7   :  { %1171 = vtanh.f32 %v144_v25  ;;  %v238_v41 = vrot.slane %v144_v25, 7 }
 0x1d4   :  { %v1172_v26 = vpop.eup %1171 }
 0x1d5   :  { %147 = vrot.lane.b32.xlu1 %v1172_v26, %s1254_s10 }
 0x247   :  { %v148_v27 = vpop.permute.xlu1 %147 }
 0x248   :  { %v150_v28 = vmul.f32 %v1170_v20, %v148_v27 }
 0x24a   :  { %152 = vrot.lane.b32.xlu0 %v150_v28, %s1255_s1 }
 0x2bc   :  { %v153_v29 = vpop.permute.xlu0 %152 }
 0x2bd   :  { %1079 = vmatmul.mubr.msk.f32.vlgmr.msra.gmra.mxu1 %vm52_vm1, %v153_v29 }
 0x2be   :  { %1093 = vmatpush3.msra.mxu1 %v1298_v1  ;;  %1100 = vmatprep.mubr.msk.f32.mxu1 %vm1252_vm0, %v1251_v2 }
 0x2bf   :  { %1094 = vmatprep.subr.mxu1 %v1251_v2 }
 0x2c0   :  { %1095 = vmatpush3.msra.mxu1 %v1304_v3 }
 0x2c1   :  { %1096 = vmatprep.subr.mxu1 %v1251_v2 }
 0x2c2   :  { %1097 = vmatpush3.msra.mxu1 %v1316_v6 }
 0x2c3   :  { %1098 = vmatprep.subr.mxu1 %v1251_v2 }
 0x2c4   :  { %1099 = vmatpush3.msra.mxu1 %v1324_v7 }
 0x2c5   :  { %1114 = vmatprep.subr.mxu1 %v1251_v2 }
 0x37d   :  { %v222_v30 = vpop.f32.mrf.mxu1 }
 0x37e   :  { %v227_v31 = vrot.slane %v222_v30, 7 }
 0x37f   :  { %v1080_v32 = vpop.f32.mrf.mxu1 }
 0x380   :  { %v229_v33 = vadd.f32 %v227_v31, %v1357_v12 }
 0x382   :  { %1173 = vtanh.f32 %v229_v33  ;;  %v1000_v35 = vmul.f32 -1.442695, %v229_v33 }
 0x384   :  { %1175 = vpow2.f32 %v1000_v35 }
 0x38f   :  { %v1174_v34 = vpop.eup %1173 }
 0x390   :  { %242 = vrot.lane.b32.xlu1 %v1174_v34, %s1254_s10 }
 0x391   :  { %v1176_v36 = vpop.eup %1175 }
 0x392   :  { %v233_v37 = vadd.f32 1.0, %v1176_v36 }
 0x394   :  { %1177 = vrcp.f32 %v233_v37 }
 0x3a1   :  { %v1178_v38 = vpop.eup %1177 }
 0x3a2   :  { %v240_v42 = vmul.f32 %v1178_v38, %v238_v41 }
 0x402   :  { %v243_v39 = vpop.permute.xlu1 %242 }
 0x403   :  { %v245_v40 = vmul.f32 %v1178_v38, %v243_v39 }
 0x405   :  { %247 = vrot.lane.b32.xlu0 %v245_v40, %s1255_s1 }
 0x477   :  { %v248_v43 = vpop.permute.xlu0 %247 }
 0x478   :  { %v250_v44 = vadd.f32 %v248_v43, %v240_v42 }
 0x47a   :  { %1179 = vtanh.f32 %v250_v44  ;;  %v345_v61 = vrot.slane %v250_v44, 7 }
 0x487   :  { %v1180_v45 = vpop.eup %1179 }
 0x488   :  { %253 = vrot.lane.b32.xlu1 %v1180_v45, %s1254_s10 }
 0x4fa   :  { %v254_v46 = vpop.permute.xlu1 %253 }
 0x4fb   :  { %v256_v47 = vmul.f32 %v1178_v38, %v254_v46 }
 0x4fd   :  { %v258_v48 = vrot.slane %v256_v47, 1 }
 0x4ff   :  { %259 = vrot.lane.b32.xlu0 %v258_v48, %s1255_s1 }
 0x571   :  { %v260_v49 = vpop.permute.xlu0 %259 }
 0x572   :  { %1090 = vmatmul.mubr.msk.f32.vlgmr.msra.gmra.mxu0 %vm52_vm1, %v260_v49 }
 0x573   :  { %1104 = vmatpush3.msra.mxu0 %v1298_v1  ;;  %1111 = vmatprep.mubr.msk.f32.mxu0 %vm1252_vm0, %v1251_v2 }
 0x574   :  { %1105 = vmatprep.subr.mxu0 %v1251_v2 }
 0x575   :  { %1106 = vmatpush3.msra.mxu0 %v1304_v3 }
 0x576   :  { %1107 = vmatprep.subr.mxu0 %v1251_v2 }
 0x577   :  { %1108 = vmatpush3.msra.mxu0 %v1316_v6 }
 0x578   :  { %1109 = vmatprep.subr.mxu0 %v1251_v2 }
 0x579   :  { %1110 = vmatpush3.msra.mxu0 %v1324_v7 }
 0x57a   :  { %1125 = vmatprep.subr.mxu0 %v1251_v2 }
 0x632   :  { %v329_v50 = vpop.f32.mrf.mxu0 }
 0x633   :  { %v334_v51 = vrot.slane %v329_v50, 6 }
 0x634   :  { %v1091_v52 = vpop.f32.mrf.mxu0 }
 0x635   :  { %v336_v53 = vadd.f32 %v334_v51, %v1357_v12 }
 0x637   :  { %1181 = vtanh.f32 %v336_v53  ;;  %v1002_v55 = vmul.f32 -1.442695, %v336_v53 }
 0x639   :  { %1183 = vpow2.f32 %v1002_v55 }
 0x644   :  { %v1182_v54 = vpop.eup %1181 }
 0x645   :  { %349 = vrot.lane.b32.xlu1 %v1182_v54, %s1254_s10 }
 0x646   :  { %v1184_v56 = vpop.eup %1183 }
 0x647   :  { %v340_v57 = vadd.f32 1.0, %v1184_v56 }
 0x649   :  { %1185 = vrcp.f32 %v340_v57 }
 0x656   :  { %v1186_v58 = vpop.eup %1185 }
 0x657   :  { %v347_v62 = vmul.f32 %v1186_v58, %v345_v61 }
 0x6b7   :  { %v350_v59 = vpop.permute.xlu1 %349 }
 0x6b8   :  { %v352_v60 = vmul.f32 %v1186_v58, %v350_v59 }
 0x6ba   :  { %354 = vrot.lane.b32.xlu0 %v352_v60, %s1255_s1 }
 0x72c   :  { %v355_v63 = vpop.permute.xlu0 %354 }
 0x72d   :  { %v357_v0 = vadd.f32 %v355_v63, %v347_v62 }
 0x72f   :  { %1187 = vtanh.f32 %v357_v0  ;;  %v452_v23 = vrot.slane %v357_v0, 7 }
 0x73c   :  { %v1188_v4 = vpop.eup %1187 }
 0x73d   :  { %360 = vrot.lane.b32.xlu1 %v1188_v4, %s1254_s10 }
 0x7af   :  { %v361_v5 = vpop.permute.xlu1 %360 }
 0x7b0   :  { %v363_v8 = vmul.f32 %v1186_v58, %v361_v5 }
 0x7b2   :  { %v365_v9 = vrot.slane %v363_v8, 2 }
 0x7b4   :  { %366 = vrot.lane.b32.xlu0 %v365_v9, %s1255_s1 }
 0x826   :  { %v367_v10 = vpop.permute.xlu0 %366 }
 0x827   :  { %1101 = vmatmul.mubr.msk.f32.vlgmr.msra.gmra.mxu1 %vm52_vm1, %v367_v10 }
 0x828   :  { %1115 = vmatpush3.msra.mxu1 %v1298_v1  ;;  %1122 = vmatprep.mubr.msk.f32.mxu1 %vm1252_vm0, %v1251_v2 }
 0x829   :  { %1116 = vmatprep.subr.mxu1 %v1251_v2 }
 0x82a   :  { %1117 = vmatpush3.msra.mxu1 %v1304_v3 }
 0x82b   :  { %1118 = vmatprep.subr.mxu1 %v1251_v2 }
 0x82c   :  { %1119 = vmatpush3.msra.mxu1 %v1316_v6 }
 0x82d   :  { %1120 = vmatprep.subr.mxu1 %v1251_v2 }
 0x82e   :  { %1121 = vmatpush3.msra.mxu1 %v1324_v7 }
 0x82f   :  { %1136 = vmatprep.subr.mxu1 %v1251_v2 }
 0x8e7   :  { %v436_v11 = vpop.f32.mrf.mxu1 }
 0x8e8   :  { %v441_v13 = vrot.slane %v436_v11, 5 }
 0x8e9   :  { %v1102_v14 = vpop.f32.mrf.mxu1 }
 0x8ea   :  { %v443_v15 = vadd.f32 %v441_v13, %v1357_v12 }
 0x8ec   :  { %1189 = vtanh.f32 %v443_v15  ;;  %v1004_v17 = vmul.f32 -1.442695, %v443_v15 }
 0x8ee   :  { %1191 = vpow2.f32 %v1004_v17 }
 0x8f9   :  { %v1190_v16 = vpop.eup %1189 }
 0x8fa   :  { %456 = vrot.lane.b32.xlu1 %v1190_v16, %s1254_s10 }
 0x8fb   :  { %v1192_v18 = vpop.eup %1191 }
 0x8fc   :  { %v447_v19 = vadd.f32 1.0, %v1192_v18 }
 0x8fe   :  { %1193 = vrcp.f32 %v447_v19 }
 0x90b   :  { %v1194_v20 = vpop.eup %1193 }
 0x90c   :  { %v454_v24 = vmul.f32 %v1194_v20, %v452_v23 }
 0x96c   :  { %v457_v21 = vpop.permute.xlu1 %456 }
 0x96d   :  { %v459_v22 = vmul.f32 %v1194_v20, %v457_v21 }
 0x96f   :  { %461 = vrot.lane.b32.xlu0 %v459_v22, %s1255_s1 }
 0x9e1   :  { %v462_v25 = vpop.permute.xlu0 %461 }
 0x9e2   :  { %v464_v26 = vadd.f32 %v462_v25, %v454_v24 }
 0x9e4   :  { %1195 = vtanh.f32 %v464_v26  ;;  %v559_v43 = vrot.slane %v464_v26, 7 }
 0x9f1   :  { %v1196_v27 = vpop.eup %1195 }
 0x9f2   :  { %467 = vrot.lane.b32.xlu1 %v1196_v27, %s1254_s10 }
 0xa64   :  { %v468_v28 = vpop.permute.xlu1 %467 }
 0xa65   :  { %v470_v29 = vmul.f32 %v1194_v20, %v468_v28 }
 0xa67   :  { %v472_v30 = vrot.slane %v470_v29, 3 }
 0xa69   :  { %473 = vrot.lane.b32.xlu0 %v472_v30, %s1255_s1 }
 0xadb   :  { %v474_v31 = vpop.permute.xlu0 %473 }
 0xadc   :  { %1112 = vmatmul.mubr.msk.f32.vlgmr.msra.gmra.mxu0 %vm52_vm1, %v474_v31 }
 0xadd   :  { %1126 = vmatpush3.msra.mxu0 %v1298_v1  ;;  %1133 = vmatprep.mubr.msk.f32.mxu0 %vm1252_vm0, %v1251_v2 }
 0xade   :  { %1127 = vmatprep.subr.mxu0 %v1251_v2 }
 0xadf   :  { %1128 = vmatpush3.msra.mxu0 %v1304_v3 }
 0xae0   :  { %1129 = vmatprep.subr.mxu0 %v1251_v2 }
 0xae1   :  { %1130 = vmatpush3.msra.mxu0 %v1316_v6 }
 0xae2   :  { %1131 = vmatprep.subr.mxu0 %v1251_v2 }
 0xae3   :  { %1132 = vmatpush3.msra.mxu0 %v1324_v7 }
 0xae4   :  { %1147 = vmatprep.subr.mxu0 %v1251_v2 }
 0xb9c   :  { %v543_v32 = vpop.f32.mrf.mxu0 }
 0xb9d   :  { %v548_v33 = vrot.slane %v543_v32, 4 }
 0xb9e   :  { %v1113_v34 = vpop.f32.mrf.mxu0 }
 0xb9f   :  { %v550_v35 = vadd.f32 %v548_v33, %v1357_v12 }
 0xba1   :  { %1197 = vtanh.f32 %v550_v35  ;;  %v1006_v37 = vmul.f32 -1.442695, %v550_v35 }
 0xba3   :  { %1199 = vpow2.f32 %v1006_v37 }
 0xbae   :  { %v1198_v36 = vpop.eup %1197 }
 0xbaf   :  { %563 = vrot.lane.b32.xlu1 %v1198_v36, %s1254_s10 }
 0xbb0   :  { %v1200_v38 = vpop.eup %1199 }
 0xbb1   :  { %v554_v39 = vadd.f32 1.0, %v1200_v38 }
 0xbb3   :  { %1201 = vrcp.f32 %v554_v39 }
 0xbc0   :  { %v1202_v40 = vpop.eup %1201 }
 0xbc1   :  { %v561_v44 = vmul.f32 %v1202_v40, %v559_v43 }
 0xc21   :  { %v564_v41 = vpop.permute.xlu1 %563 }
 0xc22   :  { %v566_v42 = vmul.f32 %v1202_v40, %v564_v41 }
 0xc24   :  { %568 = vrot.lane.b32.xlu0 %v566_v42, %s1255_s1 }
 0xc96   :  { %v569_v45 = vpop.permute.xlu0 %568 }
 0xc97   :  { %v571_v46 = vadd.f32 %v569_v45, %v561_v44  ;;  %v901_v45 = vld [vmem:[%s1480_s4 + $0x10] sm:$0xff] }
 0xc99   :  { %1203 = vtanh.f32 %v571_v46 }
 0xca6   :  { %v1204_v47 = vpop.eup %1203 }
 0xca7   :  { %574 = vrot.lane.b32.xlu1 %v1204_v47, %s1254_s10  ;;  %v899_v47 = vld [vmem:[%s1480_s4] sm:$0xff] }
 0xd19   :  { %v575_v48 = vpop.permute.xlu1 %574 }
 0xd1a   :  { %v577_v49 = vmul.f32 %v1202_v40, %v575_v48 }
 0xd1c   :  { %v579_v50 = vrot.slane %v577_v49, 4 }
 0xd1e   :  { %580 = vrot.lane.b32.xlu0 %v579_v50, %s1255_s1 }
 0xd90   :  { %v581_v51 = vpop.permute.xlu0 %580 }
 0xd91   :  { %1123 = vmatmul.mubr.msk.f32.vlgmr.msra.gmra.mxu1 %vm52_vm1, %v581_v51 }
 0xd92   :  { %1137 = vmatpush3.msra.mxu1 %v1298_v1  ;;  %1144 = vmatprep.mubr.msk.f32.mxu1 %vm1252_vm0, %v1251_v2 }
 0xd93   :  { %1138 = vmatprep.subr.mxu1 %v1251_v2 }
 0xd94   :  { %1139 = vmatpush3.msra.mxu1 %v1304_v3 }
 0xd95   :  { %1140 = vmatprep.subr.mxu1 %v1251_v2 }
 0xd96   :  { %1141 = vmatpush3.msra.mxu1 %v1316_v6 }
 0xd97   :  { %1142 = vmatprep.subr.mxu1 %v1251_v2 }
 0xd98   :  { %1143 = vmatpush3.msra.mxu1 %v1324_v7  ;;  %v666_v7 = vrot.slane %v571_v46, 7  ;;  %v900_v46 = vld [vmem:[%s1480_s4 + $0x8] sm:$0xff] }
 0xe51   :  { %v650_v52 = vpop.f32.mrf.mxu1 }
 0xe52   :  { %v655_v53 = vrot.slane %v650_v52, 3 }
 0xe53   :  { %v1124_v54 = vpop.f32.mrf.mxu1 }
 0xe54   :  { %v657_v1 = vadd.f32 %v655_v53, %v1357_v12  ;;  %v903_v53 = vld [vmem:[#allocation2] sm:$0x1] }
 0xe56   :  { %1205 = vtanh.f32 %v657_v1  ;;  %v1008_v56 = vmul.f32 -1.442695, %v657_v1 }
 0xe58   :  { %1207 = vpow2.f32 %v1008_v56 }
 0xe63   :  { %v1206_v55 = vpop.eup %1205 }
 0xe64   :  { %670 = vrot.lane.b32.xlu1 %v1206_v55, %s1254_s10 }
 0xe65   :  { %v1208_v3 = vpop.eup %1207 }
 0xe66   :  { %v661_v57 = vadd.f32 1.0, %v1208_v3 }
 0xe68   :  { %1209 = vrcp.f32 %v661_v57 }
 0xe75   :  { %v1210_v58 = vpop.eup %1209 }
 0xe76   :  { %v668_v60 = vmul.f32 %v1210_v58, %v666_v7 }
 0xed6   :  { %v671_v6 = vpop.permute.xlu1 %670 }
 0xed7   :  { %v673_v59 = vmul.f32 %v1210_v58, %v671_v6 }
 0xed9   :  { %675 = vrot.lane.b32.xlu0 %v673_v59, %s1255_s1 }
 0xf4b   :  { %v676_v61 = vpop.permute.xlu0 %675 }
 0xf4c   :  { %v678_v62 = vadd.f32 %v676_v61, %v668_v60 }
 0xf4e   :  { %1211 = vtanh.f32 %v678_v62  ;;  %v773_v21 = vrot.slane %v678_v62, 7 }
 0xf5b   :  { %v1212_v63 = vpop.eup %1211 }
 0xf5c   :  { %681 = vrot.lane.b32.xlu1 %v1212_v63, %s1254_s10 }
 0xfce   :  { %v682_v0 = vpop.permute.xlu1 %681 }
 0xfcf   :  { %v684_v4 = vmul.f32 %v1210_v58, %v682_v0 }
 0xfd1   :  { %v686_v5 = vrot.slane %v684_v4, 5 }
 0xfd3   :  { %687 = vrot.lane.b32.xlu0 %v686_v5, %s1255_s1 }
0x1045   :  { %v688_v8 = vpop.permute.xlu0 %687 }
0x1046   :  { %1134 = vmatmul.mubr.msk.f32.vlgmr.msra.gmra.mxu0 %vm52_vm1, %v688_v8 }
0x1047   :  { %1155 = vmatprep.mubr.msk.f32.mxu0 %vm1252_vm0, %v1251_v2 }
0x1106   :  { %v757_v9 = vpop.f32.mrf.mxu0 }
0x1107   :  { %v762_v10 = vrot.slane %v757_v9, 2 }
0x1108   :  { %v1135_v11 = vpop.f32.mrf.mxu0 }
0x1109   :  { %v764_v13 = vadd.f32 %v762_v10, %v1357_v12 }
0x110b   :  { %1213 = vtanh.f32 %v764_v13  ;;  %v1010_v15 = vmul.f32 -1.442695, %v764_v13 }
0x110d   :  { %1215 = vpow2.f32 %v1010_v15 }
0x1118   :  { %v1214_v14 = vpop.eup %1213 }
0x1119   :  { %777 = vrot.lane.b32.xlu1 %v1214_v14, %s1254_s10 }
0x111a   :  { %v1216_v16 = vpop.eup %1215 }
0x111b   :  { %v768_v17 = vadd.f32 1.0, %v1216_v16 }
0x111d   :  { %1217 = vrcp.f32 %v768_v17 }
0x112a   :  { %v1218_v18 = vpop.eup %1217 }
0x112b   :  { %v775_v22 = vmul.f32 %v1218_v18, %v773_v21 }
0x118b   :  { %v778_v19 = vpop.permute.xlu1 %777 }
0x118c   :  { %v780_v20 = vmul.f32 %v1218_v18, %v778_v19 }
0x118e   :  { %782 = vrot.lane.b32.xlu0 %v780_v20, %s1255_s1 }
0x1200   :  { %v783_v23 = vpop.permute.xlu0 %782 }
0x1201   :  { %v785_v24 = vadd.f32 %v783_v23, %v775_v22 }
0x1203   :  { %1219 = vtanh.f32 %v785_v24  ;;  %v880_v41 = vrot.slane %v785_v24, 7 }
0x1210   :  { %v1220_v25 = vpop.eup %1219 }
0x1211   :  { %788 = vrot.lane.b32.xlu1 %v1220_v25, %s1254_s10 }
0x1283   :  { %v789_v26 = vpop.permute.xlu1 %788 }
0x1284   :  { %v791_v27 = vmul.f32 %v1218_v18, %v789_v26 }
0x1286   :  { %v793_v28 = vrot.slane %v791_v27, 6 }
0x1288   :  { %794 = vrot.lane.b32.xlu0 %v793_v28, %s1255_s1 }
0x12fa   :  { %v795_v29 = vpop.permute.xlu0 %794 }
0x12fb   :  { %1145 = vmatmul.mubr.msk.f32.vlgmr.msra.gmra.mxu1 %vm52_vm1, %v795_v29 }
0x13bb   :  { %v864_v30 = vpop.f32.mrf.mxu1 }
0x13bc   :  { %v869_v31 = vrot.slane %v864_v30, 1 }
0x13bd   :  { %v1146_v32 = vpop.f32.mrf.mxu1 }
0x13be   :  { %v871_v33 = vadd.f32 %v869_v31, %v1357_v12  ;;  %v902_v12 = vld [vmem:[%s1480_s4 + $0x18] sm:$0xff]  ;;  %s1229_s4 = scalar_lea.vmem %s989_s19, 16 }
0x13bf   :  { %1148 = vmatpush3.msra.mxu0 %v902_v12  ;;  %p1230_p0 = scmp.ne.s32.totalorder %s989_s19, %s1229_s4  ;;  %p1235_p2 = scmp.lt.s32.totalorder %s1233_s20, %s1229_s4 }
0x13c0   :  { %1221 = vtanh.f32 %v871_v33  ;;  %v1012_v35 = vmul.f32 -1.442695, %v871_v33  ;;  %1149 = vmatprep.subr.mxu0 %v1251_v2 }
0x13c1   :  { %1150 = vmatpush3.msra.mxu0 %v901_v45  ;;  %p1236_p3 = por %p1235_p2, %p1234_p1 }
0x13c2   :  { %1223 = vpow2.f32 %v1012_v35  ;;  %1151 = vmatprep.subr.mxu0 %v1251_v2 }
0x13c3   :  { %1152 = vmatpush3.msra.mxu0 %v900_v46  ;;  %p1237_p4 = pnand %p1236_p3, %p1230_p0 }
0x13c4   :  { %1153 = vmatprep.subr.mxu0 %v1251_v2 }
0x13c5   :  { %1154 = vmatpush3.msra.mxu0 %v899_v47 }
0x13cd   :  { %v1222_v34 = vpop.eup %1221 }
0x13ce   :  { %884 = vrot.lane.b32.xlu1 %v1222_v34, %s1254_s10 }
0x13cf   :  { %v1224_v36 = vpop.eup %1223 }
0x13d0   :  { %v875_v37 = vadd.f32 1.0, %v1224_v36 }
0x13d2   :  { %1225 = vrcp.f32 %v875_v37 }
0x13df   :  { %v1226_v38 = vpop.eup %1225 }
0x13e0   :  { %v882_v42 = vmul.f32 %v1226_v38, %v880_v41 }
0x1440   :  { %v885_v39 = vpop.permute.xlu1 %884 }
0x1441   :  { %v887_v40 = vmul.f32 %v1226_v38, %v885_v39 }
0x1443   :  { %889 = vrot.lane.b32.xlu0 %v887_v40, %s1255_s1 }
0x14b5   :  { %v890_v43 = vpop.permute.xlu0 %889 }
0x14b6   :  { %v892_v44 = vadd.f32 %v890_v43, %v882_v42 }
0x14b8   :  { %1227 = vtanh.f32 %v892_v44 }
0x14c5   :  { %v1228_v48 = vpop.eup %1227 }
0x14c6   :  { %895 = vrot.lane.b32.xlu1 %v1228_v48, %s1254_s10 }
0x1538   :  { %v896_v49 = vpop.permute.xlu1 %895 }
0x1539   :  { %v898_v50 = vmul.f32 %v1226_v38, %v896_v49 }
0x153b   :  { %v905_v51 = vrot.slane %v898_v50, 7 }
0x153d   :  { %906 = vrot.lane.b32.xlu0 %v905_v51, %s1255_s1 }
0x15af   :  { %v907_v52 = vpop.permute.xlu0 %906 }
0x15b0   :  { %1156 = vmatmul.mubr.msk.f32.vlgmr.msra.gmra.mxu0 %vm52_vm1, %v907_v52 }
0x1670   :  { %v976_v54 = vpop.f32.mrf.mxu0 }
0x1671   :  { %v977_v1 = vadd.f32 %v976_v54, %v903_v53 }
0x1672   :  { %v1157_v2 = vpop.f32.mrf.mxu0 }
0x1673   :  { %981 = vst.msk [vmem:[#allocation3] sm:$0x1] %vm980_vm2, %v977_v1 }
0x1674   :  { %1240 = shalt.err (!%p1237_p4)
}
0x1675   :  { %991 = dma.vmem_to_hbm [thread:$0]  %s989_s19, 16, %s1482_s6, [#allocation4]  }
0x1676   :  { %1249 = dma.done.wait [#allocation4], 16  }
0x1677   :  { %1250 = vsyncadd [#allocation4], 4294967280 }
0x1678   :  { %995 = vsyncpa [#allocation4], 1 }

</bundles_post_ra>
